<compile_context>
chip_gen: v7x
topology: tpu7x:2x2x1
jax: 0.10.0
libtpu: 0.0.40
codegen_flags: <defaults>
</compile_context>

<pallas_src>
import functools

import jax
import jax.numpy as jnp
from jax.experimental import pallas as pl
from jax.experimental.pallas import tpu as pltpu

EM_SIZE = 16
NUM_SPARSE = 14            # 14*16 + 16 (click-history bag) + 1 (dense) = 241
DENSE_DIM = 1
FC1_IN = NUM_SPARSE * EM_SIZE + EM_SIZE + DENSE_DIM    # 241 (matches fc1)
FC1_OUT, FC2_OUT, FC3_OUT = 200, 80, 2

# Lane-padded layer widths.
N1_PAD, N2_PAD, N3_PAD = 256, 128, 128


def _round_up(x, m):
    return (x + m - 1) // m * m


def _rec_mlp_kernel(x_ref, w1_ref, b1_ref, w2_ref, b2_ref, w3_ref, b3_ref,
                    out_ref):
    """Fused fc1/relu/fc2/relu/fc3 on a lane-dense, K-padded feature slab.

    Shapes per grid step (TB = batch tile):
      x_ref  : (TB, K_pad) bf16      w1_ref : (K_pad, 256) bf16   b1: (1, 256) f32
      w2_ref : (256, 128)  bf16      b2     : (1, 128)     f32
      w3_ref : (128, 128)  bf16      b3     : (1, 128)     f32
      out_ref: (TB, 128)   f32   (cols >= 2 are zero-padded junk, sliced off)
    """
    h = jnp.dot(x_ref[...], w1_ref[...],
                preferred_element_type=jnp.float32) + b1_ref[...]
    h = jnp.maximum(h, 0.0)

    h = jnp.dot(h.astype(jnp.bfloat16), w2_ref[...],
                preferred_element_type=jnp.float32) + b2_ref[...]
    h = jnp.maximum(h, 0.0)

    out = jnp.dot(h.astype(jnp.bfloat16), w3_ref[...],
                  preferred_element_type=jnp.float32) + b3_ref[...]
    out_ref[...] = out


def init_params(key, embedding_table_lengths, em_size=EM_SIZE):
    keys = jax.random.split(key, len(embedding_table_lengths) + 6)
    # EmbeddingBag weights ~ N(0, 1)  (PyTorch default).
    tables = [jax.random.normal(keys[i], (n + 1, em_size), jnp.float32)
              for i, n in enumerate(embedding_table_lengths)]

    def linear(k, fan_in, fan_out):
        kw, kb = jax.random.split(k)
        bound = 1.0 / jnp.sqrt(jnp.float32(fan_in))
        w = jax.random.uniform(kw, (fan_out, fan_in), jnp.float32, -bound, bound)
        b = jax.random.uniform(kb, (fan_out,), jnp.float32, -bound, bound)
        return w, b

    nk = len(embedding_table_lengths)
    w1, b1 = linear(keys[nk + 0], FC1_IN, FC1_OUT)
    w2, b2 = linear(keys[nk + 1], FC1_OUT, FC2_OUT)
    w3, b3 = linear(keys[nk + 2], FC2_OUT, FC3_OUT)
    return {"tables": tables, "w1": w1, "b1": b1, "w2": w2, "b2": b2,
            "w3": w3, "b3": b3}


def prepare_model(params, hist_len):
    """One-time weight preprocessing: transpose, fuse, pad, cast to bf16."""
    H = hist_len
    k_real = NUM_SPARSE * EM_SIZE + H * EM_SIZE + DENSE_DIM
    k_pad = _round_up(k_real, 128)

    # Stacked embedding table + per-feature row offsets -> one gather later.
    sizes = [int(t.shape[0]) for t in params["tables"]]
    offs, acc = [], 0
    for s in sizes:
        offs.append(acc)
        acc += s
    stacked_table = jnp.concatenate(params["tables"], axis=0).astype(jnp.bfloat16)
    table0_zeroed = params["tables"][0].at[0, :].set(0.0).astype(jnp.bfloat16)

    # fc1: fold the bag-sum into the matmul by tiling the click-history rows.
    w1t = params["w1"].T                                         # (241, 200)
    w1a = w1t[:NUM_SPARSE * EM_SIZE]                             # (224, 200)
    w1b = w1t[NUM_SPARSE * EM_SIZE:NUM_SPARSE * EM_SIZE + EM_SIZE]  # (16, 200)
    w1c = w1t[NUM_SPARSE * EM_SIZE + EM_SIZE:]                   # (1, 200)
    w1_fused = jnp.concatenate(
        [w1a, jnp.tile(w1b, (H, 1)), w1c,
         jnp.zeros((k_pad - k_real, FC1_OUT), jnp.float32)], axis=0)  # (K_pad, 200)
    w1_pad = jnp.zeros((k_pad, N1_PAD), jnp.float32).at[:, :FC1_OUT].set(w1_fused)
    b1_pad = jnp.zeros((1, N1_PAD), jnp.float32).at[0, :FC1_OUT].set(params["b1"])

    w2_pad = jnp.zeros((N1_PAD, N2_PAD), jnp.float32
                       ).at[:FC1_OUT, :FC2_OUT].set(params["w2"].T)
    b2_pad = jnp.zeros((1, N2_PAD), jnp.float32).at[0, :FC2_OUT].set(params["b2"])

    w3_pad = jnp.zeros((N2_PAD, N3_PAD), jnp.float32
                       ).at[:FC2_OUT, :FC3_OUT].set(params["w3"].T)
    b3_pad = jnp.zeros((1, N3_PAD), jnp.float32).at[0, :FC3_OUT].set(params["b3"])

    return {
        "hist_len": H, "k_pad": k_pad, "k_real": k_real,
        "stacked_table": stacked_table,
        "table_offsets": jnp.asarray(offs, jnp.int32),
        "table0_zeroed": table0_zeroed,
        "w1": w1_pad.astype(jnp.bfloat16), "b1": b1_pad,
        "w2": w2_pad.astype(jnp.bfloat16), "b2": b2_pad,
        "w3": w3_pad.astype(jnp.bfloat16), "b3": b3_pad,
    }


def rec_model_forward(prepared, sparse_features, dense_features,
                      user_click_history):
    H = prepared["hist_len"]
    k_pad, k_real = prepared["k_pad"], prepared["k_real"]
    B = sparse_features.shape[0]

    # Single gather on the stacked table replaces 14 small gathers + concat.
    # TODO(synk): the embedding gathers stay in XLA (data-dependent row gather);
    # could be pulled in-kernel via PrefetchScalarGridSpec if they ever dominate.
    idx = prepared["table_offsets"][None, :] + 1 + sparse_features       # (B, 14)
    emb = jnp.take(prepared["stacked_table"], idx, axis=0)               # (B,14,16)
    emb = emb.reshape(B, NUM_SPARSE * EM_SIZE)                           # (B, 224)

    uch = jnp.take(prepared["table0_zeroed"], user_click_history + 1,
                   axis=0)                                               # (B, H, 16)
    uch = uch.reshape(B, H * EM_SIZE)                                    # lane-dense

    feats = jnp.concatenate(
        [emb, uch, dense_features.astype(jnp.bfloat16),
         jnp.zeros((B, k_pad - k_real), jnp.bfloat16)], axis=1)          # (B, K_pad)

    # Batch tiling: big lane/sublane-aligned tiles, padded batch.
    tb = 512 if B >= 512 else _round_up(B, 8)
    b_pad = _round_up(B, tb)
    if b_pad != B:
        feats = jnp.pad(feats, ((0, b_pad - B), (0, 0)))

    out = pl.pallas_call(
        _rec_mlp_kernel,
        out_shape=jax.ShapeDtypeStruct((b_pad, N3_PAD), jnp.float32),
        grid_spec=pltpu.PrefetchScalarGridSpec(
            num_scalar_prefetch=0,
            grid=(b_pad // tb,),
            in_specs=[
                pl.BlockSpec((tb, k_pad), lambda i: (i, 0)),       # features
                pl.BlockSpec((k_pad, N1_PAD), lambda i: (0, 0)),   # w1 (resident)
                pl.BlockSpec((1, N1_PAD), lambda i: (0, 0)),       # b1
                pl.BlockSpec((N1_PAD, N2_PAD), lambda i: (0, 0)),  # w2
                pl.BlockSpec((1, N2_PAD), lambda i: (0, 0)),       # b2
                pl.BlockSpec((N2_PAD, N3_PAD), lambda i: (0, 0)),  # w3
                pl.BlockSpec((1, N3_PAD), lambda i: (0, 0)),       # b3
            ],
            out_specs=pl.BlockSpec((tb, N3_PAD), lambda i: (i, 0)),
        ),
        compiler_params=pltpu.CompilerParams(
            dimension_semantics=("parallel",)),
    )(feats, prepared["w1"], prepared["b1"], prepared["w2"], prepared["b2"],
      prepared["w3"], prepared["b3"])

    return out[:B, :FC3_OUT]


def rec_model_reference(params, sparse_features, dense_features,
                        user_click_history):
    """Pure-JAX f32 reference mirroring the PyTorch forward."""
    tables = params["tables"]
    embs = [jnp.take(tables[i], 1 + sparse_features[:, i], axis=0)
            for i in range(NUM_SPARSE)]
    table0_zeroed = tables[0].at[0, :].set(0.0)
    uch_emb = jnp.take(table0_zeroed, user_click_history + 1, axis=0).sum(axis=1)
    feats = jnp.concatenate(embs + [uch_emb, dense_features.astype(jnp.float32)],
                            axis=1)
    x = jnp.maximum(feats @ params["w1"].T + params["b1"], 0.0)
    x = jnp.maximum(x @ params["w2"].T + params["b2"], 0.0)
    return x @ params["w3"].T + params["b3"]


if __name__ == "__main__":
    key = jax.random.PRNGKey(0)
    k_param, k_sparse, k_dense, k_hist = jax.random.split(key, 4)

    B, H = 8, 8
    embedding_table_lengths = [40 + 7 * i for i in range(NUM_SPARSE)]
    params = init_params(k_param, embedding_table_lengths)
    prepared = prepare_model(params, hist_len=H)

    sk = jax.random.split(k_sparse, NUM_SPARSE)
    sparse_features = jnp.stack(
        [jax.random.randint(sk[i], (B,), 0, embedding_table_lengths[i], jnp.int32)
         for i in range(NUM_SPARSE)], axis=1)                    # (B, 14)
    dense_features = jax.random.normal(k_dense, (B, DENSE_DIM), jnp.float32)
    # click history uses -1 as padding (maps to zeroed row 0 of table 0)
    user_click_history = jax.random.randint(
        k_hist, (B, H), -1, embedding_table_lengths[0], jnp.int32)

    fwd = jax.jit(functools.partial(rec_model_forward, prepared))
    out = jax.block_until_ready(
        fwd(sparse_features, dense_features, user_click_history))

    ref = rec_model_reference(params, sparse_features, dense_features,
                              user_click_history)
    assert out.shape == (B, FC3_OUT)
    max_err = float(jnp.max(jnp.abs(out - ref)))
    # bf16 matmul operands (f32 accumulation) vs. f32 reference -> relaxed tol.
    assert jnp.allclose(out, ref, atol=5e-2, rtol=5e-2), \
        f"mismatch vs reference, max abs err = {max_err}"

    print("KERNEL_OK")
</pallas_src>

<mosaic_0001>
module attributes {stable_mosaic.version = 11 : i64} {
  func.func @_rec_mlp_kernel(%arg0: i32, %arg1: memref<8x384xbf16, #tpu.memory_space<vmem>>, %arg2: memref<384x256xbf16, #tpu.memory_space<vmem>>, %arg3: memref<1x256xf32, #tpu.memory_space<vmem>>, %arg4: memref<256x128xbf16, #tpu.memory_space<vmem>>, %arg5: memref<1x128xf32, #tpu.memory_space<vmem>>, %arg6: memref<128x128xbf16, #tpu.memory_space<vmem>>, %arg7: memref<1x128xf32, #tpu.memory_space<vmem>>, %arg8: memref<8x128xf32, #tpu.memory_space<vmem>>) attributes {dimension_semantics = [#tpu.dimension_semantics<parallel>], iteration_bounds = array<i64: 1>, scalar_prefetch = 0 : i64, scratch_operands = 0 : i64, tpu.core_type = #tpu.core_type<tc>, window_params = [{transform_indices = @transform_0, window_bounds = array<i64: 8, 384>}, {pipeline_mode = #tpu.pipeline_mode<synchronous>, transform_indices = @transform_1, window_bounds = array<i64: 384, 256>}, {pipeline_mode = #tpu.pipeline_mode<synchronous>, transform_indices = @transform_2, window_bounds = array<i64: 1, 256>}, {pipeline_mode = #tpu.pipeline_mode<synchronous>, transform_indices = @transform_3, window_bounds = array<i64: 256, 128>}, {pipeline_mode = #tpu.pipeline_mode<synchronous>, transform_indices = @transform_4, window_bounds = array<i64: 1, 128>}, {pipeline_mode = #tpu.pipeline_mode<synchronous>, transform_indices = @transform_5, window_bounds = array<i64: 128, 128>}, {pipeline_mode = #tpu.pipeline_mode<synchronous>, transform_indices = @transform_6, window_bounds = array<i64: 1, 128>}, {transform_indices = @transform_7, window_bounds = array<i64: 8, 128>}]} {
    %c0 = arith.constant 0 : index
    %c0_0 = arith.constant 0 : index
    %0 = vector.load %arg1[%c0, %c0_0] : memref<8x384xbf16, #tpu.memory_space<vmem>>, vector<8x384xbf16>
    %c0_1 = arith.constant 0 : index
    %c0_2 = arith.constant 0 : index
    %1 = vector.load %arg2[%c0_1, %c0_2] : memref<384x256xbf16, #tpu.memory_space<vmem>>, vector<384x256xbf16>
    %cst = arith.constant dense<0.000000e+00> : vector<8x256xf32>
    %2 = tpu.matmul %0, %1, %cst {dimension_numbers = #tpu.dot_dimension_numbers<[1], [0], [0], [1], [0, 0, 1, 1], [], []>} : vector<8x384xbf16>, vector<384x256xbf16>, vector<8x256xf32> -> vector<8x256xf32>
    %c0_3 = arith.constant 0 : index
    %c0_4 = arith.constant 0 : index
    %3 = vector.load %arg3[%c0_3, %c0_4] : memref<1x256xf32, #tpu.memory_space<vmem>>, vector<1x256xf32>
    %4 = vector.broadcast %3 : vector<1x256xf32> to vector<8x256xf32>
    %5 = arith.addf %2, %4 : vector<8x256xf32>
    %cst_5 = arith.constant 0.000000e+00 : f32
    %6 = vector.broadcast %cst_5 : f32 to vector<8x256xf32>
    %7 = arith.maximumf %5, %6 : vector<8x256xf32>
    %8 = arith.truncf %7 : vector<8x256xf32> to vector<8x256xbf16>
    %c0_6 = arith.constant 0 : index
    %c0_7 = arith.constant 0 : index
    %9 = vector.load %arg4[%c0_6, %c0_7] : memref<256x128xbf16, #tpu.memory_space<vmem>>, vector<256x128xbf16>
    %cst_8 = arith.constant dense<0.000000e+00> : vector<8x128xf32>
    %10 = tpu.matmul %8, %9, %cst_8 {dimension_numbers = #tpu.dot_dimension_numbers<[1], [0], [0], [1], [0, 0, 1, 1], [], []>} : vector<8x256xbf16>, vector<256x128xbf16>, vector<8x128xf32> -> vector<8x128xf32>
    %c0_9 = arith.constant 0 : index
    %c0_10 = arith.constant 0 : index
    %11 = vector.load %arg5[%c0_9, %c0_10] : memref<1x128xf32, #tpu.memory_space<vmem>>, vector<1x128xf32>
    %12 = vector.broadcast %11 : vector<1x128xf32> to vector<8x128xf32>
    %13 = arith.addf %10, %12 : vector<8x128xf32>
    %cst_11 = arith.constant 0.000000e+00 : f32
    %14 = vector.broadcast %cst_11 : f32 to vector<8x128xf32>
    %15 = arith.maximumf %13, %14 : vector<8x128xf32>
    %16 = arith.truncf %15 : vector<8x128xf32> to vector<8x128xbf16>
    %c0_12 = arith.constant 0 : index
    %c0_13 = arith.constant 0 : index
    %17 = vector.load %arg6[%c0_12, %c0_13] : memref<128x128xbf16, #tpu.memory_space<vmem>>, vector<128x128xbf16>
    %cst_14 = arith.constant dense<0.000000e+00> : vector<8x128xf32>
    %18 = tpu.matmul %16, %17, %cst_14 {dimension_numbers = #tpu.dot_dimension_numbers<[1], [0], [0], [1], [0, 0, 1, 1], [], []>} : vector<8x128xbf16>, vector<128x128xbf16>, vector<8x128xf32> -> vector<8x128xf32>
    %c0_15 = arith.constant 0 : index
    %c0_16 = arith.constant 0 : index
    %19 = vector.load %arg7[%c0_15, %c0_16] : memref<1x128xf32, #tpu.memory_space<vmem>>, vector<1x128xf32>
    %20 = vector.broadcast %19 : vector<1x128xf32> to vector<8x128xf32>
    %21 = arith.addf %18, %20 : vector<8x128xf32>
    %c0_17 = arith.constant 0 : index
    %c0_18 = arith.constant 0 : index
    %22 = vector.load %arg8[%c0_17, %c0_18] : memref<8x128xf32, #tpu.memory_space<vmem>>, vector<8x128xf32>
    tpu.vector_store %arg8[%c0_17, %c0_18], %21 {strides = array<i32>} : memref<8x128xf32, #tpu.memory_space<vmem>>, vector<8x128xf32>,
    return
  }
  func.func @transform_0(%arg0: i32) -> (i32, i32) {
    %c0_i32 = arith.constant 0 : i32
    %c0_i32_0 = arith.constant 0 : i32
    return %arg0, %c0_i32 : i32, i32
  }
  func.func @transform_1(%arg0: i32) -> (i32, i32) {
    %c0_i32 = arith.constant 0 : i32
    %c0_i32_0 = arith.constant 0 : i32
    %c0_i32_1 = arith.constant 0 : i32
    return %c0_i32, %c0_i32_0 : i32, i32
  }
  func.func @transform_2(%arg0: i32) -> (i32, i32) {
    %c0_i32 = arith.constant 0 : i32
    %c0_i32_0 = arith.constant 0 : i32
    %c0_i32_1 = arith.constant 0 : i32
    return %c0_i32, %c0_i32_0 : i32, i32
  }
  func.func @transform_3(%arg0: i32) -> (i32, i32) {
    %c0_i32 = arith.constant 0 : i32
    %c0_i32_0 = arith.constant 0 : i32
    %c0_i32_1 = arith.constant 0 : i32
    return %c0_i32, %c0_i32_0 : i32, i32
  }
  func.func @transform_4(%arg0: i32) -> (i32, i32) {
    %c0_i32 = arith.constant 0 : i32
    %c0_i32_0 = arith.constant 0 : i32
    %c0_i32_1 = arith.constant 0 : i32
    return %c0_i32, %c0_i32_0 : i32, i32
  }
  func.func @transform_5(%arg0: i32) -> (i32, i32) {
    %c0_i32 = arith.constant 0 : i32
    %c0_i32_0 = arith.constant 0 : i32
    %c0_i32_1 = arith.constant 0 : i32
    return %c0_i32, %c0_i32_0 : i32, i32
  }
  func.func @transform_6(%arg0: i32) -> (i32, i32) {
    %c0_i32 = arith.constant 0 : i32
    %c0_i32_0 = arith.constant 0 : i32
    %c0_i32_1 = arith.constant 0 : i32
    return %c0_i32, %c0_i32_0 : i32, i32
  }
  func.func @transform_7(%arg0: i32) -> (i32, i32) {
    %c0_i32 = arith.constant 0 : i32
    %c0_i32_0 = arith.constant 0 : i32
    return %arg0, %c0_i32 : i32, i32
  }
}

</mosaic_0001>

<bundles_post_ra>
// kernel: rec_model_forward.1
= control target key start
LH: loop header
LB: loop body
LE: loop exit
PB: predicated region body
PF: predicated region fallthrough
CT: control target
= control target key end

     0   :  { %v955_v51 = vmov 0   ;;  %vm957_vm0 = vmmov 0   ;;  %s1238_s1 = inlined_call_operand.vmem [shape: bf16[384,256], index: 1, kind: input, shape index: {}]   ;;  %s1239_s0 = inlined_call_operand.vmem [shape: bf16[8,384], index: 0, kind: input, shape index: {}]   ;;  %s1240_s3 = inlined_call_operand.vmem [shape: bf16[256,128], index: 3, kind: input, shape index: {}]   ;;  %s1241_s5 = inlined_call_operand.vmem [shape: bf16[128,128], index: 5, kind: input, shape index: {}]   ;;  %s1242_s2 = inlined_call_operand.vmem [shape: f32[1,256], index: 2, kind: input, shape index: {}]   ;;  %s1243_s4 = inlined_call_operand.vmem [shape: f32[1,128], index: 4, kind: input, shape index: {}]   ;;  %s1244_s6 = inlined_call_operand.vmem [shape: f32[1,128], index: 6, kind: input, shape index: {}]   ;;  %s1245_s7 = inlined_call_operand.vmem [shape: f32[8,128], index: 7, kind: output, shape index: {}]  }
   0x1   :  { %v856_v0 = vld [vmem:[%s1238_s1 + $0x4] ss:$8 sps:$4 sm:$0xff]   ;;  %v858_v1 = vld [vmem:[%s1238_s1] ss:$8 sps:$4 sm:$0xff]   ;;  %v859_v2 = vld [vmem:[%s1238_s1 + $0x14] ss:$8 sps:$4 sm:$0xff]  }
   0x2   :  { %340 = vmatprep.subr.bf16.mxu0 %v856_v0  ;;  %v861_v3 = vld [vmem:[%s1238_s1 + $0x10] ss:$8 sps:$4 sm:$0xff]   ;;  %v862_v4 = vld [vmem:[%s1238_s1 + $0x24] ss:$8 sps:$4 sm:$0xff]   ;;  %v864_v5 = vld [vmem:[%s1238_s1 + $0x20] ss:$8 sps:$4 sm:$0xff]  }
   0x3   :  { %341 = vmatpush1.bf16.msra.mxu0 %v858_v1  ;;  %v865_v6 = vld [vmem:[%s1238_s1 + $0x34] ss:$8 sps:$4 sm:$0xff]   ;;  %v867_v7 = vld [vmem:[%s1238_s1 + $0x30] ss:$8 sps:$4 sm:$0xff]   ;;  %v868_v8 = vld [vmem:[%s1238_s1 + $0x44] ss:$8 sps:$4 sm:$0xff]  }
   0x4   :  { %342 = vmatprep.subr.bf16.mxu0 %v859_v2  ;;  %v870_v9 = vld [vmem:[%s1238_s1 + $0x40] ss:$8 sps:$4 sm:$0xff]   ;;  %v871_v10 = vld [vmem:[%s1238_s1 + $0x54] ss:$8 sps:$4 sm:$0xff]   ;;  %v873_v11 = vld [vmem:[%s1238_s1 + $0x50] ss:$8 sps:$4 sm:$0xff]  }
   0x5   :  { %v874_v12 = vld [vmem:[%s1238_s1 + $0x64] ss:$8 sps:$4 sm:$0xff]   ;;  %v876_v15 = vld [vmem:[%s1238_s1 + $0x60] ss:$8 sps:$4 sm:$0xff]   ;;  %v877_v16 = vld [vmem:[%s1238_s1 + $0x74] ss:$8 sps:$4 sm:$0xff]  }
   0x6   :  { %v1040_v13 = vld [vmem:[%s1239_s0] sm:$0xff]  ;;  %v879_v17 = vld [vmem:[%s1238_s1 + $0x70] ss:$8 sps:$4 sm:$0xff]   ;;  %v883_v20 = vld [vmem:[%s1238_s1 + $0x94] ss:$8 sps:$4 sm:$0xff]  }
   0x7   :  { %343 = vmatpush1.bf16.msra.mxu0 %v861_v3  ;;  %v720_v14 = vcombine.high %v1040_v13, %v1040_v13  ;;  %v880_v18 = vld [vmem:[%s1238_s1 + $0x84] ss:$8 sps:$4 sm:$0xff]   ;;  %v882_v19 = vld [vmem:[%s1238_s1 + $0x80] ss:$8 sps:$4 sm:$0xff]   ;;  %v885_v21 = vld [vmem:[%s1238_s1 + $0x90] ss:$8 sps:$4 sm:$0xff]   ;;  %v719_v47 = vcombine.low %v1040_v13, %v1040_v13 }
   0x8   :  { %344 = vmatprep.subr.bf16.mxu0 %v862_v4  ;;  %v931_v22 = vld [vmem:[%s1240_s3 + $0x40] sm:$0xff]   ;;  %v933_v25 = vld [vmem:[%s1240_s3 + $0x48] sm:$0xff]   ;;  %v935_v27 = vld [vmem:[%s1240_s3 + $0x50] sm:$0xff]  }
   0x9   :  { %372 = vmatprep.mubr.bf16.mxu0 %v720_v14  ;;  %v886_v23 = vld [vmem:[%s1238_s1 + $0xa4] ss:$8 sps:$4 sm:$0xff]   ;;  %796 = vmatprep.subr.bf16.mxu1 %v931_v22  ;;  %v888_v28 = vld [vmem:[%s1238_s1 + $0xa0] ss:$8 sps:$4 sm:$0xff]   ;;  %v889_v29 = vld [vmem:[%s1238_s1 + $0xb4] ss:$8 sps:$4 sm:$0xff]  }
   0xa   :  { %v932_v24 = vld [vmem:[%s1240_s3] sm:$0xff]   ;;  %v934_v26 = vld [vmem:[%s1240_s3 + $0x8] sm:$0xff]   ;;  %v936_v30 = vld [vmem:[%s1240_s3 + $0x10] sm:$0xff]  }
   0xb   :  { %345 = vmatpush1.bf16.msra.mxu0 %v864_v5  ;;  %797 = vmatpush3.bf16.msra.mxu1 %v932_v24  ;;  %v937_v31 = vld [vmem:[%s1240_s3 + $0x58] sm:$0xff]   ;;  %v892_v33 = vld [vmem:[%s1238_s1 + $0xc4] ss:$8 sps:$4 sm:$0xff]   ;;  %v894_v35 = vld [vmem:[%s1238_s1 + $0xc0] ss:$8 sps:$4 sm:$0xff]   ;;  %v956_v5 = vmov 0.0  }
   0xc   :  { %346 = vmatprep.subr.bf16.mxu0 %v865_v6  ;;  %798 = vmatprep.subr.bf16.mxu1 %v933_v25  ;;  %v891_v32 = vld [vmem:[%s1238_s1 + $0xb0] ss:$8 sps:$4 sm:$0xff]   ;;  %v939_v36 = vld [vmem:[%s1240_s3 + $0x60] sm:$0xff]   ;;  %v895_v37 = vld [vmem:[%s1238_s1 + $0xd4] ss:$8 sps:$4 sm:$0xff]   ;;  %v79_v6 = vlaneseq }
   0xd   :  { %v938_v34 = vld [vmem:[%s1240_s3 + $0x18] sm:$0xff]   ;;  %v940_v38 = vld [vmem:[%s1240_s3 + $0x20] sm:$0xff]   ;;  %v941_v39 = vld [vmem:[%s1240_s3 + $0x68] sm:$0xff]  }
   0xe   :  { %v897_v40 = vld [vmem:[%s1238_s1 + $0xd0] ss:$8 sps:$4 sm:$0xff]   ;;  %v898_v41 = vld [vmem:[%s1238_s1 + $0xe4] ss:$8 sps:$4 sm:$0xff]   ;;  %v900_v43 = vld [vmem:[%s1238_s1 + $0xe0] ss:$8 sps:$4 sm:$0xff]  }
   0xf   :  { %347 = vmatpush1.bf16.msra.mxu0 %v867_v7  ;;  %799 = vmatpush3.bf16.msra.mxu1 %v934_v26  ;;  %v942_v42 = vld [vmem:[%s1240_s3 + $0x28] sm:$0xff]   ;;  %v901_v44 = vld [vmem:[%s1238_s1 + $0xf4] ss:$8 sps:$4 sm:$0xff]   ;;  %v903_v45 = vld [vmem:[%s1238_s1 + $0xf0] ss:$8 sps:$4 sm:$0xff]   ;;  %v80_v7 = vshrl.u32 %v79_v6, 7 }
  0x10   :  { %348 = vmatprep.subr.bf16.mxu0 %v868_v8  ;;  %800 = vmatprep.subr.bf16.mxu1 %v935_v27  ;;  %v909_v46 = vld [vmem:[%s1238_s1 + $0x104] ss:$8 sps:$4 sm:$0xff]   ;;  %v907_v48 = vld [vmem:[%s1238_s1 + $0x100] ss:$8 sps:$4 sm:$0xff]   ;;  %v912_v49 = vld [vmem:[%s1238_s1 + $0x114] ss:$8 sps:$4 sm:$0xff]  }
  0x11   :  { %v910_v50 = vld [vmem:[%s1238_s1 + $0x110] ss:$8 sps:$4 sm:$0xff]   ;;  %v915_v52 = vld [vmem:[%s1238_s1 + $0x124] ss:$8 sps:$4 sm:$0xff]   ;;  %v913_v53 = vld [vmem:[%s1238_s1 + $0x120] ss:$8 sps:$4 sm:$0xff]  }
  0x12   :  { %v918_v54 = vld [vmem:[%s1238_s1 + $0x134] ss:$8 sps:$4 sm:$0xff]   ;;  %v916_v55 = vld [vmem:[%s1238_s1 + $0x130] ss:$8 sps:$4 sm:$0xff]   ;;  %v921_v56 = vld [vmem:[%s1238_s1 + $0x144] ss:$8 sps:$4 sm:$0xff]  }
  0x13   :  { %349 = vmatpush1.bf16.msra.mxu0 %v870_v9  ;;  %801 = vmatpush3.bf16.msra.mxu1 %v936_v30  ;;  %v919_v57 = vld [vmem:[%s1238_s1 + $0x140] ss:$8 sps:$4 sm:$0xff]   ;;  %v924_v58 = vld [vmem:[%s1238_s1 + $0x154] ss:$8 sps:$4 sm:$0xff]   ;;  %v922_v59 = vld [vmem:[%s1238_s1 + $0x150] ss:$8 sps:$4 sm:$0xff]  }
  0x14   :  { %350 = vmatprep.subr.bf16.mxu0 %v871_v10  ;;  %802 = vmatprep.subr.bf16.mxu1 %v937_v31  ;;  %v927_v60 = vld [vmem:[%s1238_s1 + $0x164] ss:$8 sps:$4 sm:$0xff]   ;;  %v925_v61 = vld [vmem:[%s1238_s1 + $0x160] ss:$8 sps:$4 sm:$0xff]   ;;  %v930_v62 = vld [vmem:[%s1238_s1 + $0x174] ss:$8 sps:$4 sm:$0xff]  }
  0x15   :  { %v928_v63 = vld [vmem:[%s1238_s1 + $0x170] ss:$8 sps:$4 sm:$0xff]   ;;  %v906_v0 = vld [vmem:[%s1239_s0 + $0x8] ss:$0 sps:$4 sm:$0xff]   ;;  %v81_v8 = vsub.s32 0, %v80_v7  ;;  %v85_v10 = vsub.s32 1, %v80_v7 }
  0x16   :  { %v943_v1 = vld [vmem:[%s1240_s3 + $0x70] sm:$0xff]   ;;  %v945_v3 = vld [vmem:[%s1240_s3 + $0x78] sm:$0xff]   ;;  %v77_v9 = vld [vmem:[%s1242_s2] sm:$0x3] }
  0x17   :  { %351 = vmatpush1.bf16.msra.mxu0 %v873_v11  ;;  %803 = vmatpush3.bf16.msra.mxu1 %v938_v34  ;;  %v944_v2 = vld [vmem:[%s1240_s3 + $0x30] sm:$0xff]   ;;  %v946_v4 = vld [vmem:[%s1240_s3 + $0x38] sm:$0xff]   ;;  %v82_v11 = vrot.slane %v77_v9, %v81_v8  ;;  %v947_v22 = vld [vmem:[%s1241_s5] sm:$0xff]  }
  0x18   :  { %352 = vmatprep.subr.bf16.mxu0 %v874_v12  ;;  %804 = vmatprep.subr.bf16.mxu1 %v939_v36  ;;  %v86_v12 = vrot.slane %v77_v9, %v85_v10  ;;  %v948_v24 = vld [vmem:[%s1241_s5 + $0x8] sm:$0xff]   ;;  %v949_v25 = vld [vmem:[%s1241_s5 + $0x10] sm:$0xff]   ;;  %v950_v26 = vld [vmem:[%s1241_s5 + $0x18] sm:$0xff]  }
  0x19   :  { %v951_v27 = vld [vmem:[%s1241_s5 + $0x20] sm:$0xff]   ;;  %v954_v30 = vld [vmem:[%s1241_s5 + $0x38] sm:$0xff]  }
  0x1b   :  { %353 = vmatpush1.bf16.msra.mxu0 %v876_v15  ;;  %805 = vmatpush3.bf16.msra.mxu1 %v940_v38 }
  0x1c   :  { %354 = vmatprep.subr.bf16.mxu0 %v877_v16  ;;  %806 = vmatprep.subr.bf16.mxu1 %v941_v39 }
  0x1f   :  { %355 = vmatpush1.bf16.msra.mxu0 %v879_v17  ;;  %807 = vmatpush3.bf16.msra.mxu1 %v942_v42 }
  0x20   :  { %356 = vmatprep.subr.bf16.mxu0 %v880_v18  ;;  %808 = vmatprep.subr.bf16.mxu1 %v943_v1 }
  0x23   :  { %357 = vmatpush1.bf16.msra.mxu0 %v882_v19  ;;  %809 = vmatpush3.bf16.msra.mxu1 %v944_v2 }
  0x24   :  { %358 = vmatprep.subr.bf16.mxu0 %v883_v20  ;;  %810 = vmatprep.subr.bf16.mxu1 %v945_v3 }
  0x27   :  { %359 = vmatpush1.bf16.msra.mxu0 %v885_v21  ;;  %811 = vmatpush3.bf16.msra.mxu1 %v946_v4 }
  0x28   :  { %360 = vmatprep.subr.bf16.mxu0 %v886_v23  ;;  %827 = vmatprep.subr.bf16.mxu1 %v956_v5 }
  0x2b   :  { %361 = vmatpush1.bf16.msra.mxu0 %v888_v28  ;;  %v952_v28 = vld [vmem:[%s1241_s5 + $0x28] sm:$0xff]  }
  0x2c   :  { %362 = vmatprep.subr.bf16.mxu0 %v889_v29  ;;  %v953_v29 = vld [vmem:[%s1241_s5 + $0x30] sm:$0xff]  }
  0x2f   :  { %363 = vmatpush1.bf16.msra.mxu0 %v891_v32  ;;  %v770_v32 = vld [vmem:[%s1243_s4] ss:$0 sm:$0xff] }
  0x30   :  { %364 = vmatprep.subr.bf16.mxu0 %v892_v33 }
  0x33   :  { %365 = vmatpush1.bf16.msra.mxu0 %v894_v35 }
  0x34   :  { %366 = vmatprep.subr.bf16.mxu0 %v895_v37 }
  0x37   :  { %367 = vmatpush1.bf16.msra.mxu0 %v897_v40  ;;  %v787_v40 = vld [vmem:[%s1244_s6] ss:$0 sm:$0xff] }
  0x38   :  { %368 = vmatprep.subr.bf16.mxu0 %v898_v41 }
  0x3b   :  { %369 = vmatpush1.bf16.msra.mxu0 %v900_v43 }
  0x3c   :  { %370 = vmatprep.subr.bf16.mxu0 %v901_v44 }
  0x3f   :  { %371 = vmatpush1.bf16.msra.mxu0 %v903_v45 }
  0x40   :  { %381 = vmatprep.subr.bf16.mxu0 %v909_v46 }
  0x42   :  { %373 = vmatmul.mubr.bf16.vlgmr.msra.gmra.mrb[0].mxu0 %v719_v47 }
  0x43   :  { %382 = vmatpush1.bf16.msra.mxu0 %v907_v48  ;;  %413 = vmatprep.mubr.bf16.mxu0 %v955_v51 }
  0x44   :  { %383 = vmatprep.subr.bf16.mxu0 %v912_v49 }
  0x47   :  { %384 = vmatpush1.bf16.msra.mxu0 %v910_v50 }
  0x48   :  { %385 = vmatprep.subr.bf16.mxu0 %v915_v52 }
  0x4b   :  { %386 = vmatpush1.bf16.msra.mxu0 %v913_v53 }
  0x4c   :  { %387 = vmatprep.subr.bf16.mxu0 %v918_v54 }
  0x4f   :  { %388 = vmatpush1.bf16.msra.mxu0 %v916_v55 }
  0x50   :  { %389 = vmatprep.subr.bf16.mxu0 %v921_v56 }
  0x53   :  { %390 = vmatpush1.bf16.msra.mxu0 %v919_v57 }
  0x54   :  { %391 = vmatprep.subr.bf16.mxu0 %v924_v58 }
  0x57   :  { %392 = vmatpush1.bf16.msra.mxu0 %v922_v59 }
  0x58   :  { %393 = vmatprep.subr.bf16.mxu0 %v927_v60 }
  0x5b   :  { %394 = vmatpush1.bf16.msra.mxu0 %v925_v61 }
  0x5c   :  { %395 = vmatprep.subr.bf16.mxu0 %v930_v62 }
  0x5f   :  { %396 = vmatpush1.bf16.msra.mxu0 %v928_v63 }
  0x62   :  { %414 = vmatmul.mubr.bf16.vlgmr.msra.gmra.mrb[0].mxu0 %v906_v0 }
 0x135   :  { %v415_v13 = vpop.f32.mrb[0].mxu0 }
 0x136   :  { %v847_v14 = vadd.f32 %v415_v13, %v82_v11  ;;  %v417_v15 = vpop.f32.mrb[1].mxu0 }
 0x137   :  { %v848_v16 = vadd.f32 %v417_v15, %v86_v12  ;;  %v419_v17 = vpop.f32.mrb[2].mxu0 }
 0x138   :  { %v422_v18 = vmax.f32 %v847_v14, 0.0  ;;  %v420_v19 = vpop.f32.mrb[3].mxu0 }
 0x139   :  { %v423_v20 = vmax.f32 %v848_v16, 0.0 }
 0x13a   :  { %v424_v23 = vpack.c.bf16 %v422_v18, %v422_v18 }
 0x13b   :  { %v425_v21 = vpack.c.bf16 %v423_v20, %v423_v20 }
 0x13d   :  { %593 = vmatprep.mubr.bf16.mxu1 %v425_v21 }
 0x13e   :  { %594 = vmatmul.mubr.bf16.vlgmr.msra.gmra.mrb[0].mxu1 %v424_v23 }
 0x13f   :  { %828 = vmatpush3.bf16.msra.mxu1 %v947_v22  ;;  %843 = vmatprep.mubr.msk.bf16.mxu1 %vm957_vm0, %v956_v5 }
 0x140   :  { %829 = vmatprep.subr.bf16.mxu1 %v956_v5 }
 0x143   :  { %830 = vmatpush3.bf16.msra.mxu1 %v948_v24 }
 0x144   :  { %831 = vmatprep.subr.bf16.mxu1 %v956_v5 }
 0x147   :  { %832 = vmatpush3.bf16.msra.mxu1 %v949_v25 }
 0x148   :  { %833 = vmatprep.subr.bf16.mxu1 %v956_v5 }
 0x14b   :  { %834 = vmatpush3.bf16.msra.mxu1 %v950_v26 }
 0x14c   :  { %835 = vmatprep.subr.bf16.mxu1 %v956_v5 }
 0x14f   :  { %836 = vmatpush3.bf16.msra.mxu1 %v951_v27 }
 0x150   :  { %837 = vmatprep.subr.bf16.mxu1 %v956_v5 }
 0x153   :  { %838 = vmatpush3.bf16.msra.mxu1 %v952_v28 }
 0x154   :  { %839 = vmatprep.subr.bf16.mxu1 %v956_v5 }
 0x157   :  { %840 = vmatpush3.bf16.msra.mxu1 %v953_v29 }
 0x158   :  { %841 = vmatprep.subr.bf16.mxu1 %v956_v5 }
 0x15b   :  { %842 = vmatpush3.bf16.msra.mxu1 %v954_v30 }
 0x211   :  { %v812_v31 = vpop.f32.mrb[0].mxu1 }
 0x212   :  { %v813_v33 = vpop.f32.mrb[1].mxu1 }
 0x213   :  { %v814_v34 = vadd.f32 %v813_v33, %v812_v31  ;;  %v815_v35 = vpop.f32.mrb[2].mxu1 }
 0x214   :  { %v816_v36 = vpop.f32.mrb[3].mxu1 }
 0x215   :  { %v596_v37 = vadd.f32 %v814_v34, %v770_v32 }
 0x217   :  { %v601_v38 = vmax.f32 %v596_v37, 0.0 }
 0x219   :  { %v602_v39 = vpack.c.bf16 %v601_v38, %v601_v38 }
 0x21b   :  { %844 = vmatmul.mubr.bf16.vlgmr.msra.gmra.mrb[4].mxu1 %v602_v39 }
 0x2ee   :  { %v708_v41 = vpop.f32.mrb[4].mxu1 }
 0x2ef   :  { %v709_v42 = vadd.f32 %v787_v40, %v708_v41  ;;  %v845_v43 = vpop.f32.mrb[5].mxu1 }
 0x2f0   :  { %v711_v44 = vpop.f32.mrb[6].mxu1 }
 0x2f1   :  { %714 = vst [vmem:[%s1245_s7] sm:$0xff] %v709_v42  ;;  %v846_v45 = vpop.f32.mrb[7].mxu1 }

</bundles_post_ra>
